<compile_context>
chip_gen: v7x
topology: tpu7x:2x2x1
jax: 0.10.0
libtpu: 0.0.40
codegen_flags: <defaults>
</compile_context>

<pallas_src>
import jax
import jax.numpy as jnp
from jax import lax
from jax.experimental import pallas as pl
from jax.experimental.pallas import tpu as pltpu

LN_EPS = 1e-5


def block_kernel(x_ref, wt_ref, b_ref, g_ref, beta_ref, o_ref):
    # x_ref:    (tm, C)  input rows (streamed)
    # wt_ref:   (C, C)   pre-transposed weight (in, out) -> standard (M,K)x(K,N)
    # b_ref:    (1, C)   linear bias
    # g_ref:    (1, C)   layernorm weight (gamma)
    # beta_ref: (1, C)   layernorm bias  (beta)
    #
    # Linear: x @ W.T + b, realized as x @ wT with f32 accumulation on the MXU.
    y = jnp.dot(x_ref[...], wt_ref[...], preferred_element_type=jnp.float32)
    y = y + b_ref[...].astype(jnp.float32)

    # LayerNorm over channels in f32, single reduction pass:
    #   var = E[y^2] - mean^2   (clamped at 0 against rounding)
    mean = jnp.mean(y, axis=-1, keepdims=True)
    var = jnp.maximum(jnp.mean(y * y, axis=-1, keepdims=True) - mean * mean, 0.0)
    # Fuse gamma into the normalization scale (one fewer full-tile multiply).
    scale = lax.rsqrt(var + LN_EPS) * g_ref[...].astype(jnp.float32)
    out = (y - mean) * scale + beta_ref[...].astype(jnp.float32)

    # ReLU.
    o_ref[...] = jnp.maximum(out, 0.0).astype(o_ref.dtype)


def _round_up(x, m):
    return (x + m - 1) // m * m


def _vmem_cap_bytes():
    # Per-generation clamp: ~85% of physical VMEM; conservative 64 MiB fallback
    # (safe on v7x, merely tighter than needed on v5e/v6e).
    try:
        cap = int(pltpu.get_tpu_info().vmem_capacity_bytes)
    except Exception:
        cap = 64 * 1024 * 1024
    return max(int(cap * 0.85), 16 * 1024 * 1024)


def _pick_row_tile(M, tm_req, sub):
    """Pick an MXU-aligned row tile with bounded padding waste."""
    if M <= 256:
        # Single tile covering all rows, rounded only to the sublane quantum.
        tm = _round_up(M, sub)
        return tm, tm
    # Candidate tiles: 256-multiples from the request downward, then 128.
    cands = []
    t = _round_up(min(tm_req, _round_up(M, 256)), 256)
    while t >= 256:
        cands.append(t)
        t //= 2
    cands.append(128)
    for t in cands:
        m_pad = _round_up(M, t)
        if (m_pad - M) / m_pad <= 0.15:     # accept <=15% padded work
            return t, m_pad
    t = 128                                  # least-waste MXU-aligned fallback
    return t, _round_up(M, t)


def block_forward(x, w, b, gamma, beta, *, tm=1024, compute_dtype=None):
    """Fused Linear(C->C) + LayerNorm(C) + ReLU over the trailing channel axis.

    x: (..., C) channels-last.  w: (C, C) PyTorch convention (out, in).
    compute_dtype: optional (e.g. jnp.bfloat16) wrapper-side cast of x / W for
    halved HBM traffic and the bf16 MXU rate; LayerNorm math stays in f32.
    """
    orig_shape = x.shape
    out_dtype = x.dtype
    C = orig_shape[-1]
    x2d = x.reshape(-1, C)
    M = x2d.shape[0]

    # One-time wrapper-side transpose: kernel matmul is then (M,K)x(K,N) with
    # no per-grid-step transpose of the (C,C) weight tile.
    wt = jnp.swapaxes(w, 0, 1)

    if compute_dtype is not None:
        x2d = x2d.astype(compute_dtype)
        wt = wt.astype(compute_dtype)

    x_item = jnp.dtype(x2d.dtype).itemsize
    w_item = jnp.dtype(wt.dtype).itemsize
    o_item = jnp.dtype(out_dtype).itemsize
    # Min sublane quantum: 8 rows for 4-byte, 16 for 2-byte, 32 for 1-byte.
    sub = max(8, 32 // min(x_item, o_item))

    tm_eff, M_pad = _pick_row_tile(M, tm, sub)

    vmem_cap = _vmem_cap_bytes()

    def vmem_need(t):
        return (2 * t * C * x_item        # x tile, double-buffered
                + 2 * t * C * o_item      # out tile, double-buffered
                + 2 * C * C * w_item      # resident weight (conservative 2x)
                + 2 * t * C * 4           # f32 matmul / LayerNorm intermediates
                + 16 * C * 4              # bias / gamma / beta vectors
                + (2 << 20))              # headroom

    # Shrink the row tile if the budget would exceed the per-generation cap.
    while vmem_need(tm_eff) > vmem_cap and tm_eff > sub:
        tm_eff = max(sub, _round_up(tm_eff // 2, sub))
        M_pad = _round_up(M, tm_eff)
    # TODO(synk): for very large C (resident weight alone near the VMEM cap on
    # v7x) add an output-channel grid axis with a (C, tn) weight tile plus a
    # two-pass LayerNorm; not needed for the module default C=512.

    if M_pad != M:
        x2d = jnp.pad(x2d, ((0, M_pad - M), (0, 0)))

    b2 = b.reshape(1, C)
    g2 = gamma.reshape(1, C)
    beta2 = beta.reshape(1, C)

    vmem_limit = int(min(max(vmem_need(tm_eff), 32 * 1024 * 1024), vmem_cap))

    out = pl.pallas_call(
        block_kernel,
        out_shape=jax.ShapeDtypeStruct((M_pad, C), out_dtype),
        grid_spec=pltpu.PrefetchScalarGridSpec(
            num_scalar_prefetch=0,
            grid=(M_pad // tm_eff,),
            in_specs=[
                pl.BlockSpec((tm_eff, C), lambda i: (i, 0)),   # x rows (streamed)
                pl.BlockSpec((C, C), lambda i: (0, 0)),        # W^T (in,out), resident
                pl.BlockSpec((1, C), lambda i: (0, 0)),        # linear bias
                pl.BlockSpec((1, C), lambda i: (0, 0)),        # LN gamma
                pl.BlockSpec((1, C), lambda i: (0, 0)),        # LN beta
            ],
            out_specs=pl.BlockSpec((tm_eff, C), lambda i: (i, 0)),
        ),
        compiler_params=pltpu.CompilerParams(
            dimension_semantics=("parallel",),   # M axis shards across TCs (v7x)
            vmem_limit_bytes=vmem_limit,
        ),
    )(x2d, wt, b2, g2, beta2)

    if M_pad != M:
        out = out[:M]
    return out.reshape(orig_shape)


def block_reference(x, w, b, gamma, beta):
    """Pure-JAX reference matching torch semantics."""
    y = jnp.einsum("...i,oi->...o", x, w) + b
    mean = jnp.mean(y, axis=-1, keepdims=True)
    var = jnp.mean((y - mean) ** 2, axis=-1, keepdims=True)
    y = (y - mean) / jnp.sqrt(var + LN_EPS)
    y = y * gamma + beta
    return jnp.maximum(y, 0.0)


if __name__ == "__main__":
    key = jax.random.PRNGKey(0)
    channels = 512                      # module default
    batch, seq = 2, 8

    k_x, k_w, k_b, k_x2 = jax.random.split(key, 4)
    x = jax.random.normal(k_x, (batch, seq, channels), dtype=jnp.float32)

    # Deterministic parameter init (matches module __init__ shapes).
    bound = 1.0 / (channels ** 0.5)
    w = jax.random.uniform(k_w, (channels, channels),
                           minval=-bound, maxval=bound, dtype=jnp.float32)
    b = jax.random.uniform(k_b, (channels,),
                           minval=-bound, maxval=bound, dtype=jnp.float32)
    gamma = jnp.ones((channels,), dtype=jnp.float32)
    beta = jnp.zeros((channels,), dtype=jnp.float32)

    # Small smoke test (single tile, no padding).
    out = jax.block_until_ready(block_forward(x, w, b, gamma, beta))
    ref = block_reference(x, w, b, gamma, beta)
    assert out.shape == ref.shape
    assert jnp.allclose(out, ref, atol=1e-4, rtol=1e-4), "mismatch vs reference"

    # Second check: non-divisible row count -> exercises padding + multi-step grid.
    x2 = jax.random.normal(k_x2, (3, 100, channels), dtype=jnp.float32)
    out2 = jax.block_until_ready(block_forward(x2, w, b, gamma, beta))
    ref2 = block_reference(x2, w, b, gamma, beta)
    assert out2.shape == ref2.shape
    assert jnp.allclose(out2, ref2, atol=1e-4, rtol=1e-4), "mismatch (padded path)"

    print("KERNEL_OK")
</pallas_src>

<mosaic_0001>
module attributes {stable_mosaic.version = 11 : i64} {
  func.func @block_kernel(%arg0: i32, %arg1: memref<16x512xf32, #tpu.memory_space<vmem>>, %arg2: memref<512x512xf32, #tpu.memory_space<vmem>>, %arg3: memref<1x512xf32, #tpu.memory_space<vmem>>, %arg4: memref<1x512xf32, #tpu.memory_space<vmem>>, %arg5: memref<1x512xf32, #tpu.memory_space<vmem>>, %arg6: memref<16x512xf32, #tpu.memory_space<vmem>>) attributes {dimension_semantics = [#tpu.dimension_semantics<parallel>], iteration_bounds = array<i64: 1>, scalar_prefetch = 0 : i64, scratch_operands = 0 : i64, tpu.core_type = #tpu.core_type<tc>, window_params = [{transform_indices = @transform_0, window_bounds = array<i64: 16, 512>}, {pipeline_mode = #tpu.pipeline_mode<synchronous>, transform_indices = @transform_1, window_bounds = array<i64: 512, 512>}, {pipeline_mode = #tpu.pipeline_mode<synchronous>, transform_indices = @transform_2, window_bounds = array<i64: 1, 512>}, {pipeline_mode = #tpu.pipeline_mode<synchronous>, transform_indices = @transform_3, window_bounds = array<i64: 1, 512>}, {pipeline_mode = #tpu.pipeline_mode<synchronous>, transform_indices = @transform_4, window_bounds = array<i64: 1, 512>}, {transform_indices = @transform_5, window_bounds = array<i64: 16, 512>}]} {
    %c0 = arith.constant 0 : index
    %c0_0 = arith.constant 0 : index
    %0 = vector.load %arg1[%c0, %c0_0] : memref<16x512xf32, #tpu.memory_space<vmem>>, vector<16x512xf32>
    %c0_1 = arith.constant 0 : index
    %c0_2 = arith.constant 0 : index
    %1 = vector.load %arg2[%c0_1, %c0_2] : memref<512x512xf32, #tpu.memory_space<vmem>>, vector<512x512xf32>
    %cst = arith.constant dense<0.000000e+00> : vector<16x512xf32>
    %2 = tpu.matmul %0, %1, %cst {dimension_numbers = #tpu.dot_dimension_numbers<[1], [0], [0], [1], [0, 0, 1, 1], [], []>} : vector<16x512xf32>, vector<512x512xf32>, vector<16x512xf32> -> vector<16x512xf32>
    %c0_3 = arith.constant 0 : index
    %c0_4 = arith.constant 0 : index
    %3 = vector.load %arg3[%c0_3, %c0_4] : memref<1x512xf32, #tpu.memory_space<vmem>>, vector<1x512xf32>
    %4 = vector.broadcast %3 : vector<1x512xf32> to vector<16x512xf32>
    %5 = arith.addf %2, %4 : vector<16x512xf32>
    %cst_5 = arith.constant dense<0.000000e+00> : vector<16xf32>
    %6 = vector.multi_reduction <add>, %5, %cst_5 [1] : vector<16x512xf32> to vector<16xf32>
    %7 = vector.shape_cast %6 : vector<16xf32> to vector<16x1xf32>
    %cst_6 = arith.constant 5.120000e+02 : f32
    %8 = vector.broadcast %cst_6 : f32 to vector<16x1xf32>
    %9 = arith.divf %7, %8 : vector<16x1xf32>
    %10 = arith.mulf %5, %5 : vector<16x512xf32>
    %cst_7 = arith.constant dense<0.000000e+00> : vector<16xf32>
    %11 = vector.multi_reduction <add>, %10, %cst_7 [1] : vector<16x512xf32> to vector<16xf32>
    %12 = vector.shape_cast %11 : vector<16xf32> to vector<16x1xf32>
    %cst_8 = arith.constant 5.120000e+02 : f32
    %13 = vector.broadcast %cst_8 : f32 to vector<16x1xf32>
    %14 = arith.divf %12, %13 : vector<16x1xf32>
    %15 = arith.mulf %9, %9 : vector<16x1xf32>
    %16 = arith.subf %14, %15 : vector<16x1xf32>
    %cst_9 = arith.constant 0.000000e+00 : f32
    %17 = vector.broadcast %cst_9 : f32 to vector<16x1xf32>
    %18 = arith.maximumf %16, %17 : vector<16x1xf32>
    %cst_10 = arith.constant 9.99999974E-6 : f32
    %19 = vector.broadcast %cst_10 : f32 to vector<16x1xf32>
    %20 = arith.addf %18, %19 : vector<16x1xf32>
    %21 = math.rsqrt %20 : vector<16x1xf32>
    %c0_11 = arith.constant 0 : index
    %c0_12 = arith.constant 0 : index
    %22 = vector.load %arg4[%c0_11, %c0_12] : memref<1x512xf32, #tpu.memory_space<vmem>>, vector<1x512xf32>
    %23 = vector.broadcast %21 : vector<16x1xf32> to vector<16x512xf32>
    %24 = vector.broadcast %22 : vector<1x512xf32> to vector<16x512xf32>
    %25 = arith.mulf %23, %24 : vector<16x512xf32>
    %26 = vector.broadcast %9 : vector<16x1xf32> to vector<16x512xf32>
    %27 = arith.subf %5, %26 : vector<16x512xf32>
    %28 = arith.mulf %27, %25 : vector<16x512xf32>
    %c0_13 = arith.constant 0 : index
    %c0_14 = arith.constant 0 : index
    %29 = vector.load %arg5[%c0_13, %c0_14] : memref<1x512xf32, #tpu.memory_space<vmem>>, vector<1x512xf32>
    %30 = vector.broadcast %29 : vector<1x512xf32> to vector<16x512xf32>
    %31 = arith.addf %28, %30 : vector<16x512xf32>
    %cst_15 = arith.constant 0.000000e+00 : f32
    %32 = vector.broadcast %cst_15 : f32 to vector<16x512xf32>
    %33 = arith.maximumf %31, %32 : vector<16x512xf32>
    %c0_16 = arith.constant 0 : index
    %c0_17 = arith.constant 0 : index
    %34 = vector.load %arg6[%c0_16, %c0_17] : memref<16x512xf32, #tpu.memory_space<vmem>>, vector<16x512xf32>
    tpu.vector_store %arg6[%c0_16, %c0_17], %33 {strides = array<i32>} : memref<16x512xf32, #tpu.memory_space<vmem>>, vector<16x512xf32>,
    return
  }
  func.func @transform_0(%arg0: i32) -> (i32, i32) {
    %c0_i32 = arith.constant 0 : i32
    %c0_i32_0 = arith.constant 0 : i32
    return %arg0, %c0_i32 : i32, i32
  }
  func.func @transform_1(%arg0: i32) -> (i32, i32) {
    %c0_i32 = arith.constant 0 : i32
    %c0_i32_0 = arith.constant 0 : i32
    %c0_i32_1 = arith.constant 0 : i32
    return %c0_i32, %c0_i32_0 : i32, i32
  }
  func.func @transform_2(%arg0: i32) -> (i32, i32) {
    %c0_i32 = arith.constant 0 : i32
    %c0_i32_0 = arith.constant 0 : i32
    %c0_i32_1 = arith.constant 0 : i32
    return %c0_i32, %c0_i32_0 : i32, i32
  }
  func.func @transform_3(%arg0: i32) -> (i32, i32) {
    %c0_i32 = arith.constant 0 : i32
    %c0_i32_0 = arith.constant 0 : i32
    %c0_i32_1 = arith.constant 0 : i32
    return %c0_i32, %c0_i32_0 : i32, i32
  }
  func.func @transform_4(%arg0: i32) -> (i32, i32) {
    %c0_i32 = arith.constant 0 : i32
    %c0_i32_0 = arith.constant 0 : i32
    %c0_i32_1 = arith.constant 0 : i32
    return %c0_i32, %c0_i32_0 : i32, i32
  }
  func.func @transform_5(%arg0: i32) -> (i32, i32) {
    %c0_i32 = arith.constant 0 : i32
    %c0_i32_0 = arith.constant 0 : i32
    return %arg0, %c0_i32 : i32, i32
  }
}

</mosaic_0001>

<bundles_post_ra>
// kernel: tpu_custom_call.1
= control target key start
LH: loop header
LB: loop body
LE: loop exit
PB: predicated region body
PF: predicated region fallthrough
CT: control target
= control target key end

     0   :  { %10 = vsyncpa [#allocation3], 0  ;;  %s1306_s0 = inlined_call_operand.hbm [shape: f32[16,512], index: 0, kind: input, shape index: {}]   ;;  %s1307_s1 = inlined_call_operand.hbm [shape: f32[512,512], index: 1, kind: input, shape index: {}]   ;;  %s1308_s2 = inlined_call_operand.vmem [shape: f32[1,512], index: 2, kind: input, shape index: {}]   ;;  %s1309_s3 = inlined_call_operand.vmem [shape: f32[1,512], index: 3, kind: input, shape index: {}]   ;;  %s1310_s4 = inlined_call_operand.vmem [shape: f32[1,512], index: 4, kind: input, shape index: {}]   ;;  %s1311_s5 = inlined_call_operand.hbm [shape: f32[16,512], index: 5, kind: output, shape index: {}]  }
   0x1   :  { %11 = vsyncpa [#allocation6], 0 }
   0x2   :  { %12 = vsyncpa [#allocation4], 0  ;;  %s1149_s18 = smov [#allocation2]   ;;  %s1077_s22 = scalar_lea.hbm %s1306_s0, 1024 }
   0x3   :  { %s18_s19 = sshll.u32 %s1149_s18, 4  ;;  %p1078_p0 = scmp.ne.s32.totalorder %s1306_s0, %s1077_s22  ;;  %s19_s19 = int_to_ptr.vmem [resolvable:$true] %s18_s19 }
   0x4   :  { %p1081_p1 = scmp.lt.u32.totalorder %s1077_s22, %s1306_s0 }
   0x6   :  { %p1083_p2 = pnand %p1081_p1, %p1078_p0 }
   0x8   :  { %1086 = shalt.err (!%p1083_p2)
}
   0x9   :  { %s1087_s27 = scalar_lea.vmem %s19_s19, 1024  ;;  %p1092_p4 = scmp.lt.s32.totalorder %s19_s19, %s19_s19 }
   0xa   :  { %p1088_p3 = scmp.ne.s32.totalorder %s19_s19, %s1087_s27  ;;  %p1093_p5 = scmp.lt.s32.totalorder %s1087_s27, %s1087_s27 }
   0xc   :  { %p1094_p6 = por %p1093_p5, %p1092_p4 }
   0xe   :  { %p1095_p7 = pnand %p1094_p6, %p1088_p3 }
  0x10   :  { %1098 = shalt.err (!%p1095_p7)
}
  0x11   :  { %s1150_s28 = smov 512   ;;  %s1151_s29 = smov 32  }
  0x12   :  { %24 = dma.hbm_to_vmem [thread:$0]  %s1306_s0, 1024, %s19_s19, [#allocation3], %s1150_s28, %s1150_s28, %s1151_s29  }
  0x13   :  { %s1152_s7 = smov [#allocation5]   ;;  %s1099_s11 = scalar_lea.hbm %s1307_s1, 32768 }
  0x14   :  { %s30_s8 = sshll.u32 %s1152_s7, 4  ;;  %p1100_p8 = scmp.ne.s32.totalorder %s1307_s1, %s1099_s11  ;;  %s31_s8 = int_to_ptr.vmem [resolvable:$true] %s30_s8 }
  0x15   :  { %p1103_p9 = scmp.lt.u32.totalorder %s1099_s11, %s1307_s1 }
  0x17   :  { %p1105_p10 = pnand %p1103_p9, %p1100_p8 }
  0x19   :  { %1108 = shalt.err (!%p1105_p10)
}
  0x1a   :  { %s1109_s16 = scalar_lea.vmem %s31_s8, 32768  ;;  %p1114_p12 = scmp.lt.s32.totalorder %s31_s8, %s31_s8 }
  0x1b   :  { %p1110_p11 = scmp.ne.s32.totalorder %s31_s8, %s1109_s16  ;;  %p1115_p13 = scmp.lt.s32.totalorder %s1109_s16, %s1109_s16 }
  0x1d   :  { %p1116_p0 = por %p1115_p13, %p1114_p12 }
  0x1f   :  { %p1117_p1 = pnand %p1116_p0, %p1110_p11 }
  0x21   :  { %1120 = shalt.err (!%p1117_p1)
}
  0x22   :  { %36 = dma.hbm_to_vmem [thread:$0]  %s1307_s1, 32768, %s31_s8, [#allocation6], %s1150_s28, %s1150_s28, %s1151_s29  }
  0x23   :  { %1143 = dma.done.wait [#allocation3], 1024  }
  0x24   :  { %1144 = vsyncadd [#allocation3], 4294966272 }
  0x25   :  { %1145 = dma.done.wait [#allocation6], 32768  }
  0x26   :  { %1146 = vsyncadd [#allocation6], 4294934528  ;;  %v58_v0 = vld [vmem:[#allocation5 + $0x8] sm:$0xff]  ;;  %v60_v2 = vld [vmem:[#allocation5 + $0x18] sm:$0xff] }
  0x27   :  { %v62_v1 = vld [vmem:[#allocation5 + $0x28] sm:$0xff]  ;;  %v64_v4 = vld [vmem:[#allocation5 + $0x38] sm:$0xff]  ;;  %v57_v5 = vld [vmem:[#allocation5] sm:$0xff] }
  0x28   :  { %v796_v3 = vpack.c.bf16 %v62_v1, %v58_v0  ;;  %v61_v6 = vld [vmem:[#allocation5 + $0x20] sm:$0xff]  ;;  %v924_v7 = vpack.c.bf16 %v64_v4, %v60_v2  ;;  %v59_v9 = vld [vmem:[#allocation5 + $0x10] sm:$0xff]  ;;  %v66_v11 = vld [vmem:[#allocation5 + $0x48] sm:$0xff] }
  0x29   :  { %v798_v8 = vpack.c.bf16 %v61_v6, %v57_v5  ;;  %v63_v10 = vld [vmem:[#allocation5 + $0x30] sm:$0xff]  ;;  %v70_v13 = vld [vmem:[#allocation5 + $0x68] sm:$0xff]  ;;  %v68_v14 = vld [vmem:[#allocation5 + $0x58] sm:$0xff] }
  0x2a   :  { %797 = vmatprep.subr.bf16.mxu0 %v796_v3  ;;  %v926_v12 = vpack.c.bf16 %v63_v10, %v59_v9  ;;  %v72_v15 = vld [vmem:[#allocation5 + $0x78] sm:$0xff]  ;;  %925 = vmatprep.subr.bf16.mxu1 %v924_v7  ;;  %v800_v16 = vpack.c.bf16 %v70_v13, %v66_v11  ;;  %v65_v18 = vld [vmem:[#allocation5 + $0x40] sm:$0xff]  ;;  %v67_v20 = vld [vmem:[#allocation5 + $0x50] sm:$0xff] }
  0x2b   :  { %799 = vmatpush1.bf16.msra.mxu0 %v798_v8  ;;  %v928_v17 = vpack.c.bf16 %v72_v15, %v68_v14  ;;  %v69_v19 = vld [vmem:[#allocation5 + $0x60] sm:$0xff]  ;;  %v71_v22 = vld [vmem:[#allocation5 + $0x70] sm:$0xff]  ;;  %v74_v23 = vld [vmem:[#allocation5 + $0x88] sm:$0xff] }
  0x2c   :  { %927 = vmatpush1.bf16.msra.mxu1 %v926_v12  ;;  %v802_v21 = vpack.c.bf16 %v69_v19, %v65_v18  ;;  %v78_v24 = vld [vmem:[#allocation5 + $0xa8] sm:$0xff]  ;;  %801 = vmatprep.subr.bf16.mxu0 %v800_v16  ;;  %v930_v25 = vpack.c.bf16 %v71_v22, %v67_v20  ;;  %v76_v27 = vld [vmem:[#allocation5 + $0x98] sm:$0xff]  ;;  %v73_v29 = vld [vmem:[#allocation5 + $0x80] sm:$0xff] }
  0x2d   :  { %929 = vmatprep.subr.bf16.mxu1 %v928_v17  ;;  %v804_v26 = vpack.c.bf16 %v78_v24, %v74_v23  ;;  %v80_v28 = vld [vmem:[#allocation5 + $0xb8] sm:$0xff]  ;;  %v77_v31 = vld [vmem:[#allocation5 + $0xa0] sm:$0xff]  ;;  %v75_v32 = vld [vmem:[#allocation5 + $0x90] sm:$0xff] }
  0x2e   :  { %v932_v30 = vpack.c.bf16 %v80_v28, %v76_v27  ;;  %v79_v33 = vld [vmem:[#allocation5 + $0xb0] sm:$0xff]  ;;  %v806_v34 = vpack.c.bf16 %v77_v31, %v73_v29  ;;  %v82_v35 = vld [vmem:[#allocation5 + $0xc8] sm:$0xff]  ;;  %v84_v37 = vld [vmem:[#allocation5 + $0xd8] sm:$0xff] }
  0x2f   :  { %803 = vmatpush1.bf16.msra.mxu0 %v802_v21  ;;  %v86_v36 = vld [vmem:[#allocation5 + $0xe8] sm:$0xff]  ;;  %v934_v38 = vpack.c.bf16 %v79_v33, %v75_v32  ;;  %v88_v40 = vld [vmem:[#allocation5 + $0xf8] sm:$0xff]  ;;  %v81_v41 = vld [vmem:[#allocation5 + $0xc0] sm:$0xff] }
  0x30   :  { %931 = vmatpush1.bf16.msra.mxu1 %v930_v25  ;;  %805 = vmatprep.subr.bf16.mxu0 %v804_v26  ;;  %v808_v39 = vpack.c.bf16 %v86_v36, %v82_v35  ;;  %v85_v42 = vld [vmem:[#allocation5 + $0xe0] sm:$0xff]  ;;  %v936_v43 = vpack.c.bf16 %v88_v40, %v84_v37  ;;  %v83_v44 = vld [vmem:[#allocation5 + $0xd0] sm:$0xff]  ;;  %v90_v46 = vld [vmem:[#allocation5 + $0x108] sm:$0xff] }
  0x31   :  { %933 = vmatprep.subr.bf16.mxu1 %v932_v30  ;;  %v87_v45 = vld [vmem:[#allocation5 + $0xf0] sm:$0xff]  ;;  %v94_v47 = vld [vmem:[#allocation5 + $0x128] sm:$0xff]  ;;  %v92_v48 = vld [vmem:[#allocation5 + $0x118] sm:$0xff]  ;;  %v810_v50 = vpack.c.bf16 %v85_v42, %v81_v41 }
  0x32   :  { %v96_v49 = vld [vmem:[#allocation5 + $0x138] sm:$0xff]  ;;  %v938_v51 = vpack.c.bf16 %v87_v45, %v83_v44  ;;  %v812_v52 = vpack.c.bf16 %v94_v47, %v90_v46  ;;  %v89_v53 = vld [vmem:[#allocation5 + $0x100] sm:$0xff]  ;;  %v91_v55 = vld [vmem:[#allocation5 + $0x110] sm:$0xff] }
  0x33   :  { %807 = vmatpush1.bf16.msra.mxu0 %v806_v34  ;;  %v93_v54 = vld [vmem:[#allocation5 + $0x120] sm:$0xff]  ;;  %v940_v56 = vpack.c.bf16 %v96_v49, %v92_v48  ;;  %v95_v57 = vld [vmem:[#allocation5 + $0x130] sm:$0xff]  ;;  %v98_v58 = vld [vmem:[#allocation5 + $0x148] sm:$0xff] }
  0x34   :  { %935 = vmatpush1.bf16.msra.mxu1 %v934_v38  ;;  %809 = vmatprep.subr.bf16.mxu0 %v808_v39  ;;  %v102_v59 = vld [vmem:[#allocation5 + $0x168] sm:$0xff]  ;;  %v100_v60 = vld [vmem:[#allocation5 + $0x158] sm:$0xff]  ;;  %v814_v62 = vpack.c.bf16 %v93_v54, %v89_v53  ;;  %v942_v63 = vpack.c.bf16 %v95_v57, %v91_v55  ;;  %v97_v1 = vld [vmem:[#allocation5 + $0x140] sm:$0xff] }
  0x35   :  { %937 = vmatprep.subr.bf16.mxu1 %v936_v43  ;;  %v104_v61 = vld [vmem:[#allocation5 + $0x178] sm:$0xff]  ;;  %v816_v0 = vpack.c.bf16 %v102_v59, %v98_v58  ;;  %v101_v2 = vld [vmem:[#allocation5 + $0x160] sm:$0xff]  ;;  %v99_v3 = vld [vmem:[#allocation5 + $0x150] sm:$0xff] }
  0x36   :  { %v944_v4 = vpack.c.bf16 %v104_v61, %v100_v60  ;;  %v103_v5 = vld [vmem:[#allocation5 + $0x170] sm:$0xff]  ;;  %v106_v6 = vld [vmem:[#allocation5 + $0x188] sm:$0xff]  ;;  %v108_v8 = vld [vmem:[#allocation5 + $0x198] sm:$0xff]  ;;  %v818_v10 = vpack.c.bf16 %v101_v2, %v97_v1 }
  0x37   :  { %811 = vmatpush1.bf16.msra.mxu0 %v810_v50  ;;  %v110_v7 = vld [vmem:[#allocation5 + $0x1a8] sm:$0xff]  ;;  %v112_v9 = vld [vmem:[#allocation5 + $0x1b8] sm:$0xff]  ;;  %v946_v11 = vpack.c.bf16 %v103_v5, %v99_v3  ;;  %v105_v13 = vld [vmem:[#allocation5 + $0x180] sm:$0xff] }
  0x38   :  { %939 = vmatpush1.bf16.msra.mxu1 %v938_v51  ;;  %813 = vmatprep.subr.bf16.mxu0 %v812_v52  ;;  %v820_v12 = vpack.c.bf16 %v110_v7, %v106_v6  ;;  %v109_v14 = vld [vmem:[#allocation5 + $0x1a0] sm:$0xff]  ;;  %v107_v15 = vld [vmem:[#allocation5 + $0x190] sm:$0xff]  ;;  %v948_v16 = vpack.c.bf16 %v112_v9, %v108_v8  ;;  %v114_v18 = vld [vmem:[#allocation5 + $0x1c8] sm:$0xff] }
  0x39   :  { %941 = vmatprep.subr.bf16.mxu1 %v940_v56  ;;  %v111_v17 = vld [vmem:[#allocation5 + $0x1b0] sm:$0xff]  ;;  %v118_v19 = vld [vmem:[#allocation5 + $0x1e8] sm:$0xff]  ;;  %v116_v20 = vld [vmem:[#allocation5 + $0x1d8] sm:$0xff]  ;;  %v822_v22 = vpack.c.bf16 %v109_v14, %v105_v13 }
  0x3a   :  { %v120_v21 = vld [vmem:[#allocation5 + $0x1f8] sm:$0xff]  ;;  %v950_v23 = vpack.c.bf16 %v111_v17, %v107_v15  ;;  %v824_v24 = vpack.c.bf16 %v118_v19, %v114_v18  ;;  %v113_v25 = vld [vmem:[#allocation5 + $0x1c0] sm:$0xff]  ;;  %v115_v27 = vld [vmem:[#allocation5 + $0x1d0] sm:$0xff] }
  0x3b   :  { %815 = vmatpush1.bf16.msra.mxu0 %v814_v62  ;;  %v117_v26 = vld [vmem:[#allocation5 + $0x1e0] sm:$0xff]  ;;  %v952_v28 = vpack.c.bf16 %v120_v21, %v116_v20  ;;  %v119_v29 = vld [vmem:[#allocation5 + $0x1f0] sm:$0xff]  ;;  %v122_v30 = vld [vmem:[#allocation5 + $0x208] sm:$0xff] }
  0x3c   :  { %943 = vmatpush1.bf16.msra.mxu1 %v942_v63  ;;  %817 = vmatprep.subr.bf16.mxu0 %v816_v0  ;;  %v126_v31 = vld [vmem:[#allocation5 + $0x228] sm:$0xff]  ;;  %v124_v32 = vld [vmem:[#allocation5 + $0x218] sm:$0xff]  ;;  %v826_v34 = vpack.c.bf16 %v117_v26, %v113_v25  ;;  %v954_v35 = vpack.c.bf16 %v119_v29, %v115_v27  ;;  %v121_v37 = vld [vmem:[#allocation5 + $0x200] sm:$0xff] }
  0x3d   :  { %945 = vmatprep.subr.bf16.mxu1 %v944_v4  ;;  %v128_v33 = vld [vmem:[#allocation5 + $0x238] sm:$0xff]  ;;  %v828_v36 = vpack.c.bf16 %v126_v31, %v122_v30  ;;  %v125_v38 = vld [vmem:[#allocation5 + $0x220] sm:$0xff]  ;;  %v123_v39 = vld [vmem:[#allocation5 + $0x210] sm:$0xff] }
  0x3e   :  { %v956_v40 = vpack.c.bf16 %v128_v33, %v124_v32  ;;  %v127_v41 = vld [vmem:[#allocation5 + $0x230] sm:$0xff]  ;;  %v130_v42 = vld [vmem:[#allocation5 + $0x248] sm:$0xff]  ;;  %v132_v44 = vld [vmem:[#allocation5 + $0x258] sm:$0xff]  ;;  %v830_v46 = vpack.c.bf16 %v125_v38, %v121_v37 }
  0x3f   :  { %819 = vmatpush1.bf16.msra.mxu0 %v818_v10  ;;  %v134_v43 = vld [vmem:[#allocation5 + $0x268] sm:$0xff]  ;;  %v136_v45 = vld [vmem:[#allocation5 + $0x278] sm:$0xff]  ;;  %v958_v47 = vpack.c.bf16 %v127_v41, %v123_v39  ;;  %v129_v49 = vld [vmem:[#allocation5 + $0x240] sm:$0xff] }
  0x40   :  { %947 = vmatpush1.bf16.msra.mxu1 %v946_v11  ;;  %821 = vmatprep.subr.bf16.mxu0 %v820_v12  ;;  %v832_v48 = vpack.c.bf16 %v134_v43, %v130_v42  ;;  %v133_v50 = vld [vmem:[#allocation5 + $0x260] sm:$0xff]  ;;  %v131_v51 = vld [vmem:[#allocation5 + $0x250] sm:$0xff]  ;;  %v960_v52 = vpack.c.bf16 %v136_v45, %v132_v44  ;;  %v138_v54 = vld [vmem:[#allocation5 + $0x288] sm:$0xff] }
  0x41   :  { %949 = vmatprep.subr.bf16.mxu1 %v948_v16  ;;  %v135_v53 = vld [vmem:[#allocation5 + $0x270] sm:$0xff]  ;;  %v142_v55 = vld [vmem:[#allocation5 + $0x2a8] sm:$0xff]  ;;  %v140_v56 = vld [vmem:[#allocation5 + $0x298] sm:$0xff]  ;;  %v834_v58 = vpack.c.bf16 %v133_v50, %v129_v49 }
  0x42   :  { %v144_v57 = vld [vmem:[#allocation5 + $0x2b8] sm:$0xff]  ;;  %v962_v59 = vpack.c.bf16 %v135_v53, %v131_v51  ;;  %v836_v60 = vpack.c.bf16 %v142_v55, %v138_v54  ;;  %v137_v61 = vld [vmem:[#allocation5 + $0x280] sm:$0xff]  ;;  %v139_v63 = vld [vmem:[#allocation5 + $0x290] sm:$0xff] }
  0x43   :  { %823 = vmatpush1.bf16.msra.mxu0 %v822_v22  ;;  %v141_v62 = vld [vmem:[#allocation5 + $0x2a0] sm:$0xff]  ;;  %v964_v0 = vpack.c.bf16 %v144_v57, %v140_v56  ;;  %v143_v1 = vld [vmem:[#allocation5 + $0x2b0] sm:$0xff]  ;;  %v146_v2 = vld [vmem:[#allocation5 + $0x2c8] sm:$0xff] }
  0x44   :  { %951 = vmatpush1.bf16.msra.mxu1 %v950_v23  ;;  %825 = vmatprep.subr.bf16.mxu0 %v824_v24  ;;  %v150_v3 = vld [vmem:[#allocation5 + $0x2e8] sm:$0xff]  ;;  %v148_v4 = vld [vmem:[#allocation5 + $0x2d8] sm:$0xff]  ;;  %v838_v6 = vpack.c.bf16 %v141_v62, %v137_v61  ;;  %v145_v7 = vld [vmem:[#allocation5 + $0x2c0] sm:$0xff]  ;;  %v966_v8 = vpack.c.bf16 %v143_v1, %v139_v63 }
  0x45   :  { %953 = vmatprep.subr.bf16.mxu1 %v952_v28  ;;  %v152_v5 = vld [vmem:[#allocation5 + $0x2f8] sm:$0xff]  ;;  %v840_v9 = vpack.c.bf16 %v150_v3, %v146_v2  ;;  %v149_v10 = vld [vmem:[#allocation5 + $0x2e0] sm:$0xff]  ;;  %v147_v11 = vld [vmem:[#allocation5 + $0x2d0] sm:$0xff] }
  0x46   :  { %v151_v12 = vld [vmem:[#allocation5 + $0x2f0] sm:$0xff]  ;;  %v968_v13 = vpack.c.bf16 %v152_v5, %v148_v4  ;;  %v154_v14 = vld [vmem:[#allocation5 + $0x308] sm:$0xff]  ;;  %v156_v17 = vld [vmem:[#allocation5 + $0x318] sm:$0xff]  ;;  %v842_v19 = vpack.c.bf16 %v149_v10, %v145_v7 }
  0x47   :  { %827 = vmatpush1.bf16.msra.mxu0 %v826_v34  ;;  %v158_v15 = vld [vmem:[#allocation5 + $0x328] sm:$0xff]  ;;  %v160_v18 = vld [vmem:[#allocation5 + $0x338] sm:$0xff]  ;;  %v970_v20 = vpack.c.bf16 %v151_v12, %v147_v11  ;;  %v153_v22 = vld [vmem:[#allocation5 + $0x300] sm:$0xff] }
  0x48   :  { %955 = vmatpush1.bf16.msra.mxu1 %v954_v35  ;;  %829 = vmatprep.subr.bf16.mxu0 %v828_v36  ;;  %v50_v16 = vld [vmem:[#allocation2 + $0x8] sm:$0xff]  ;;  %v844_v21 = vpack.c.bf16 %v158_v15, %v154_v14  ;;  %v157_v23 = vld [vmem:[#allocation5 + $0x320] sm:$0xff]  ;;  %v155_v24 = vld [vmem:[#allocation5 + $0x310] sm:$0xff]  ;;  %v972_v25 = vpack.c.bf16 %v160_v18, %v156_v17 }
  0x49   :  { %957 = vmatprep.subr.bf16.mxu1 %v956_v40  ;;  %399 = vmatprep.mubr.f32.mxu0 %v50_v16  ;;  %v159_v26 = vld [vmem:[#allocation5 + $0x330] sm:$0xff]  ;;  %v162_v27 = vld [vmem:[#allocation5 + $0x348] sm:$0xff]  ;;  %v164_v29 = vld [vmem:[#allocation5 + $0x358] sm:$0xff]  ;;  %v846_v31 = vpack.c.bf16 %v157_v23, %v153_v22 }
  0x4a   :  { %553 = vmatprep.mubr.f32.mxu1 %v50_v16  ;;  %v166_v28 = vld [vmem:[#allocation5 + $0x368] sm:$0xff]  ;;  %v168_v30 = vld [vmem:[#allocation5 + $0x378] sm:$0xff]  ;;  %v974_v32 = vpack.c.bf16 %v159_v26, %v155_v24  ;;  %v161_v34 = vld [vmem:[#allocation5 + $0x340] sm:$0xff] }
  0x4b   :  { %831 = vmatpush1.bf16.msra.mxu0 %v830_v46  ;;  %v848_v33 = vpack.c.bf16 %v166_v28, %v162_v27  ;;  %v165_v35 = vld [vmem:[#allocation5 + $0x360] sm:$0xff]  ;;  %v163_v36 = vld [vmem:[#allocation5 + $0x350] sm:$0xff]  ;;  %v976_v37 = vpack.c.bf16 %v168_v30, %v164_v29  ;;  %v170_v39 = vld [vmem:[#allocation5 + $0x388] sm:$0xff] }
  0x4c   :  { %959 = vmatpush1.bf16.msra.mxu1 %v958_v47  ;;  %833 = vmatprep.subr.bf16.mxu0 %v832_v48  ;;  %v167_v38 = vld [vmem:[#allocation5 + $0x370] sm:$0xff]  ;;  %v174_v40 = vld [vmem:[#allocation5 + $0x3a8] sm:$0xff]  ;;  %v172_v41 = vld [vmem:[#allocation5 + $0x398] sm:$0xff]  ;;  %v850_v43 = vpack.c.bf16 %v165_v35, %v161_v34 }
  0x4d   :  { %961 = vmatprep.subr.bf16.mxu1 %v960_v52  ;;  %v176_v42 = vld [vmem:[#allocation5 + $0x3b8] sm:$0xff]  ;;  %v978_v44 = vpack.c.bf16 %v167_v38, %v163_v36  ;;  %v852_v45 = vpack.c.bf16 %v174_v40, %v170_v39  ;;  %v169_v46 = vld [vmem:[#allocation5 + $0x380] sm:$0xff]  ;;  %v171_v48 = vld [vmem:[#allocation5 + $0x390] sm:$0xff] }
  0x4e   :  { %v173_v47 = vld [vmem:[#allocation5 + $0x3a0] sm:$0xff]  ;;  %v980_v49 = vpack.c.bf16 %v176_v42, %v172_v41  ;;  %v175_v50 = vld [vmem:[#allocation5 + $0x3b0] sm:$0xff]  ;;  %v178_v51 = vld [vmem:[#allocation5 + $0x3c8] sm:$0xff] }
  0x4f   :  { %835 = vmatpush1.bf16.msra.mxu0 %v834_v58  ;;  %v182_v52 = vld [vmem:[#allocation5 + $0x3e8] sm:$0xff]  ;;  %v180_v53 = vld [vmem:[#allocation5 + $0x3d8] sm:$0xff]  ;;  %v854_v55 = vpack.c.bf16 %v173_v47, %v169_v46  ;;  %v982_v56 = vpack.c.bf16 %v175_v50, %v171_v48  ;;  %v177_v58 = vld [vmem:[#allocation5 + $0x3c0] sm:$0xff] }
  0x50   :  { %963 = vmatpush1.bf16.msra.mxu1 %v962_v59  ;;  %837 = vmatprep.subr.bf16.mxu0 %v836_v60  ;;  %v184_v54 = vld [vmem:[#allocation5 + $0x3f8] sm:$0xff]  ;;  %v856_v57 = vpack.c.bf16 %v182_v52, %v178_v51  ;;  %v181_v59 = vld [vmem:[#allocation5 + $0x3e0] sm:$0xff]  ;;  %v179_v60 = vld [vmem:[#allocation5 + $0x3d0] sm:$0xff] }
  0x51   :  { %965 = vmatprep.subr.bf16.mxu1 %v964_v0  ;;  %v984_v61 = vpack.c.bf16 %v184_v54, %v180_v53  ;;  %v183_v62 = vld [vmem:[#allocation5 + $0x3f0] sm:$0xff]  ;;  %v186_v63 = vld [vmem:[#allocation5 + $0x408] sm:$0xff]  ;;  %v188_v1 = vld [vmem:[#allocation5 + $0x418] sm:$0xff]  ;;  %v858_v3 = vpack.c.bf16 %v181_v59, %v177_v58 }
  0x52   :  { %v190_v0 = vld [vmem:[#allocation5 + $0x428] sm:$0xff]  ;;  %v192_v2 = vld [vmem:[#allocation5 + $0x438] sm:$0xff]  ;;  %v986_v4 = vpack.c.bf16 %v183_v62, %v179_v60  ;;  %v189_v7 = vld [vmem:[#allocation5 + $0x420] sm:$0xff] }
  0x53   :  { %839 = vmatpush1.bf16.msra.mxu0 %v838_v6  ;;  %v860_v5 = vpack.c.bf16 %v190_v0, %v186_v63  ;;  %v185_v6 = vld [vmem:[#allocation5 + $0x400] sm:$0xff]  ;;  %v191_v10 = vld [vmem:[#allocation5 + $0x430] sm:$0xff]  ;;  %v194_v11 = vld [vmem:[#allocation5 + $0x448] sm:$0xff] }
  0x54   :  { %967 = vmatpush1.bf16.msra.mxu1 %v966_v8  ;;  %841 = vmatprep.subr.bf16.mxu0 %v840_v9  ;;  %v187_v8 = vld [vmem:[#allocation5 + $0x410] sm:$0xff]  ;;  %v988_v9 = vpack.c.bf16 %v192_v2, %v188_v1  ;;  %v198_v12 = vld [vmem:[#allocation5 + $0x468] sm:$0xff]  ;;  %v200_v14 = vld [vmem:[#allocation5 + $0x478] sm:$0xff]  ;;  %v862_v16 = vpack.c.bf16 %v189_v7, %v185_v6 }
  0x55   :  { %969 = vmatprep.subr.bf16.mxu1 %v968_v13  ;;  %v196_v13 = vld [vmem:[#allocation5 + $0x458] sm:$0xff]  ;;  %v49_v15 = vld [vmem:[#allocation2] sm:$0xff]  ;;  %v990_v17 = vpack.c.bf16 %v191_v10, %v187_v8  ;;  %v864_v18 = vpack.c.bf16 %v198_v12, %v194_v11  ;;  %v199_v23 = vld [vmem:[#allocation5 + $0x470] sm:$0xff] }
  0x56   :  { %v992_v22 = vpack.c.bf16 %v200_v14, %v196_v13  ;;  %v202_v24 = vld [vmem:[#allocation5 + $0x488] sm:$0xff]  ;;  %v204_v26 = vld [vmem:[#allocation5 + $0x498] sm:$0xff]  ;;  %v207_v35 = vld [vmem:[#allocation5 + $0x4b0] sm:$0xff] }
  0x57   :  { %843 = vmatpush1.bf16.msra.mxu0 %v842_v19  ;;  %v193_v19 = vld [vmem:[#allocation5 + $0x440] sm:$0xff]  ;;  %v208_v27 = vld [vmem:[#allocation5 + $0x4b8] sm:$0xff]  ;;  %v210_v36 = vld [vmem:[#allocation5 + $0x4c8] sm:$0xff] }
  0x58   :  { %971 = vmatpush1.bf16.msra.mxu1 %v970_v20  ;;  %845 = vmatprep.subr.bf16.mxu0 %v844_v21  ;;  %v197_v20 = vld [vmem:[#allocation5 + $0x460] sm:$0xff]  ;;  %v195_v21 = vld [vmem:[#allocation5 + $0x450] sm:$0xff]  ;;  %v996_v34 = vpack.c.bf16 %v208_v27, %v204_v26  ;;  %v212_v38 = vld [vmem:[#allocation5 + $0x4d8] sm:$0xff] }
  0x59   :  { %973 = vmatprep.subr.bf16.mxu1 %v972_v25  ;;  %v206_v25 = vld [vmem:[#allocation5 + $0x4a8] sm:$0xff]  ;;  %v866_v28 = vpack.c.bf16 %v197_v20, %v193_v19  ;;  %v994_v29 = vpack.c.bf16 %v199_v23, %v195_v21  ;;  %v216_v39 = vld [vmem:[#allocation5 + $0x4f8] sm:$0xff]  ;;  %v215_v47 = vld [vmem:[#allocation5 + $0x4f0] sm:$0xff] }
  0x5a   :  { %v868_v30 = vpack.c.bf16 %v206_v25, %v202_v24  ;;  %v1000_v46 = vpack.c.bf16 %v216_v39, %v212_v38  ;;  %v218_v48 = vld [vmem:[#allocation5 + $0x508] sm:$0xff]  ;;  %v220_v50 = vld [vmem:[#allocation5 + $0x518] sm:$0xff]  ;;  %v223_v59 = vld [vmem:[#allocation5 + $0x530] sm:$0xff] }
  0x5b   :  { %847 = vmatpush1.bf16.msra.mxu0 %v846_v31  ;;  %v201_v31 = vld [vmem:[#allocation5 + $0x480] sm:$0xff]  ;;  %v224_v51 = vld [vmem:[#allocation5 + $0x538] sm:$0xff]  ;;  %v226_v60 = vld [vmem:[#allocation5 + $0x548] sm:$0xff] }
  0x5c   :  { %975 = vmatpush1.bf16.msra.mxu1 %v974_v32  ;;  %849 = vmatprep.subr.bf16.mxu0 %v848_v33  ;;  %v205_v32 = vld [vmem:[#allocation5 + $0x4a0] sm:$0xff]  ;;  %v203_v33 = vld [vmem:[#allocation5 + $0x490] sm:$0xff]  ;;  %v1004_v58 = vpack.c.bf16 %v224_v51, %v220_v50  ;;  %v228_v62 = vld [vmem:[#allocation5 + $0x558] sm:$0xff] }
  0x5d   :  { %977 = vmatprep.subr.bf16.mxu1 %v976_v37  ;;  %v214_v37 = vld [vmem:[#allocation5 + $0x4e8] sm:$0xff]  ;;  %v870_v40 = vpack.c.bf16 %v205_v32, %v201_v31  ;;  %v998_v41 = vpack.c.bf16 %v207_v35, %v203_v33  ;;  %v232_v63 = vld [vmem:[#allocation5 + $0x578] sm:$0xff]  ;;  %v231_v7 = vld [vmem:[#allocation5 + $0x570] sm:$0xff] }
  0x5e   :  { %v872_v42 = vpack.c.bf16 %v214_v37, %v210_v36  ;;  %v1008_v6 = vpack.c.bf16 %v232_v63, %v228_v62  ;;  %v234_v8 = vld [vmem:[#allocation5 + $0x588] sm:$0xff]  ;;  %v236_v10 = vld [vmem:[#allocation5 + $0x598] sm:$0xff]  ;;  %v233_v14 = vld [vmem:[#allocation5 + $0x580] sm:$0xff] }
  0x5f   :  { %851 = vmatpush1.bf16.msra.mxu0 %v850_v43  ;;  %v209_v43 = vld [vmem:[#allocation5 + $0x4c0] sm:$0xff]  ;;  %v240_v11 = vld [vmem:[#allocation5 + $0x5b8] sm:$0xff]  ;;  %v54_v12 = vld [vmem:[#allocation2 + $0x28] sm:$0xff] }
  0x60   :  { %979 = vmatpush1.bf16.msra.mxu1 %v978_v44  ;;  %853 = vmatprep.subr.bf16.mxu0 %v852_v45  ;;  %v213_v44 = vld [vmem:[#allocation5 + $0x4e0] sm:$0xff]  ;;  %v211_v45 = vld [vmem:[#allocation5 + $0x4d0] sm:$0xff]  ;;  %v1012_v21 = vpack.c.bf16 %v240_v11, %v236_v10  ;;  %v246_v23 = vld [vmem:[#allocation5 + $0x5e8] sm:$0xff] }
  0x61   :  { %981 = vmatprep.subr.bf16.mxu1 %v980_v49  ;;  %v222_v49 = vld [vmem:[#allocation5 + $0x528] sm:$0xff]  ;;  %v874_v52 = vpack.c.bf16 %v213_v44, %v209_v43  ;;  %v1002_v53 = vpack.c.bf16 %v215_v47, %v211_v45  ;;  %v235_v19 = vld [vmem:[#allocation5 + $0x590] sm:$0xff]  ;;  %v52_v24 = vld [vmem:[#allocation2 + $0x18] sm:$0xff] }
  0x62   :  { %v876_v54 = vpack.c.bf16 %v222_v49, %v218_v48  ;;  %v239_v20 = vld [vmem:[#allocation5 + $0x5b0] sm:$0xff]  ;;  %v244_v25 = vld [vmem:[#allocation5 + $0x5d8] sm:$0xff]  ;;  %v245_v31 = vld [vmem:[#allocation5 + $0x5e0] sm:$0xff] }
  0x63   :  { %855 = vmatpush1.bf16.msra.mxu0 %v854_v55  ;;  %v217_v55 = vld [vmem:[#allocation5 + $0x500] sm:$0xff]  ;;  %v248_v26 = vld [vmem:[#allocation5 + $0x5f8] sm:$0xff]  ;;  %v243_v32 = vld [vmem:[#allocation5 + $0x5d0] sm:$0xff] }
  0x64   :  { %983 = vmatpush1.bf16.msra.mxu1 %v982_v56  ;;  %857 = vmatprep.subr.bf16.mxu0 %v856_v57  ;;  %v221_v56 = vld [vmem:[#allocation5 + $0x520] sm:$0xff]  ;;  %v219_v57 = vld [vmem:[#allocation5 + $0x510] sm:$0xff]  ;;  %v1016_v33 = vpack.c.bf16 %v248_v26, %v244_v25  ;;  %v250_v35 = vld [vmem:[#allocation5 + $0x608] sm:$0xff] }
  0x65   :  { %985 = vmatprep.subr.bf16.mxu1 %v984_v61  ;;  %v230_v61 = vld [vmem:[#allocation5 + $0x568] sm:$0xff]  ;;  %v878_v0 = vpack.c.bf16 %v221_v56, %v217_v55  ;;  %v1006_v1 = vpack.c.bf16 %v223_v59, %v219_v57  ;;  %v252_v37 = vld [vmem:[#allocation5 + $0x618] sm:$0xff]  ;;  %v253_v43 = vld [vmem:[#allocation5 + $0x620] sm:$0xff] }
  0x66   :  { %v880_v2 = vpack.c.bf16 %v230_v61, %v226_v60  ;;  %v254_v36 = vld [vmem:[#allocation5 + $0x628] sm:$0xff]  ;;  %v256_v38 = vld [vmem:[#allocation5 + $0x638] sm:$0xff]  ;;  %v251_v44 = vld [vmem:[#allocation5 + $0x610] sm:$0xff] }
  0x67   :  { %859 = vmatpush1.bf16.msra.mxu0 %v858_v3  ;;  %v225_v3 = vld [vmem:[#allocation5 + $0x540] sm:$0xff]  ;;  %v1020_v45 = vpack.c.bf16 %v256_v38, %v252_v37  ;;  %v258_v47 = vld [vmem:[#allocation5 + $0x648] sm:$0xff]  ;;  %v260_v49 = vld [vmem:[#allocation5 + $0x658] sm:$0xff] }
  0x68   :  { %987 = vmatpush1.bf16.msra.mxu1 %v986_v4  ;;  %861 = vmatprep.subr.bf16.mxu0 %v860_v5  ;;  %v229_v4 = vld [vmem:[#allocation5 + $0x560] sm:$0xff]  ;;  %v227_v5 = vld [vmem:[#allocation5 + $0x550] sm:$0xff]  ;;  %v262_v48 = vld [vmem:[#allocation5 + $0x668] sm:$0xff] }
  0x69   :  { %989 = vmatprep.subr.bf16.mxu1 %v988_v9  ;;  %v238_v9 = vld [vmem:[#allocation5 + $0x5a8] sm:$0xff]  ;;  %v882_v13 = vpack.c.bf16 %v229_v4, %v225_v3  ;;  %v264_v50 = vld [vmem:[#allocation5 + $0x678] sm:$0xff]  ;;  %v261_v55 = vld [vmem:[#allocation5 + $0x660] sm:$0xff] }
  0x6a   :  { %400 = vmatmul.mubr.f32.vlgmr.msra.gmra.mrb[0].mxu0 %v49_v15  ;;  %v259_v56 = vld [vmem:[#allocation5 + $0x650] sm:$0xff]  ;;  %v1024_v57 = vpack.c.bf16 %v264_v50, %v260_v49  ;;  %v266_v59 = vld [vmem:[#allocation5 + $0x688] sm:$0xff]  ;;  %v268_v61 = vld [vmem:[#allocation5 + $0x698] sm:$0xff] }
  0x6b   :  { %863 = vmatpush1.bf16.msra.mxu0 %v862_v16  ;;  %554 = vmatmul.mubr.f32.vlgmr.msra.gmra.mrb[0].mxu1 %v49_v15  ;;  %v53_v15 = vld [vmem:[#allocation2 + $0x20] sm:$0xff]  ;;  %v1010_v16 = vpack.c.bf16 %v231_v7, %v227_v5  ;;  %v270_v60 = vld [vmem:[#allocation5 + $0x6a8] sm:$0xff]  ;;  %v272_v62 = vld [vmem:[#allocation5 + $0x6b8] sm:$0xff] }
  0x6c   :  { %991 = vmatpush1.bf16.msra.mxu1 %v990_v17  ;;  %865 = vmatprep.subr.bf16.mxu0 %v864_v18  ;;  %v884_v17 = vpack.c.bf16 %v238_v9, %v234_v8  ;;  %v237_v18 = vld [vmem:[#allocation5 + $0x5a0] sm:$0xff]  ;;  %v267_v4 = vld [vmem:[#allocation5 + $0x690] sm:$0xff]  ;;  %v1028_v5 = vpack.c.bf16 %v272_v62, %v268_v61  ;;  %v274_v7 = vld [vmem:[#allocation5 + $0x6c8] sm:$0xff] }
  0x6d   :  { %993 = vmatprep.subr.bf16.mxu1 %v992_v22  ;;  %405 = vmatprep.mubr.f32.mxu0 %v54_v12  ;;  %v242_v22 = vld [vmem:[#allocation5 + $0x5c8] sm:$0xff]  ;;  %v886_v27 = vpack.c.bf16 %v237_v18, %v233_v14  ;;  %v269_v3 = vld [vmem:[#allocation5 + $0x6a0] sm:$0xff]  ;;  %v276_v9 = vld [vmem:[#allocation5 + $0x6d8] sm:$0xff] }
  0x6e   :  { %559 = vmatprep.mubr.f32.mxu1 %v54_v12  ;;  %406 = vmatmul.mubr.f32.gmra.mrb[2].mxu0 %v53_v15  ;;  %v278_v8 = vld [vmem:[#allocation5 + $0x6e8] sm:$0xff]  ;;  %v280_v10 = vld [vmem:[#allocation5 + $0x6f8] sm:$0xff]  ;;  %v273_v14 = vld [vmem:[#allocation5 + $0x6c0] sm:$0xff] }
  0x6f   :  { %867 = vmatpush1.bf16.msra.mxu0 %v866_v28  ;;  %560 = vmatmul.mubr.f32.gmra.mrb[2].mxu1 %v53_v15  ;;  %v1014_v28 = vpack.c.bf16 %v239_v20, %v235_v19  ;;  %v277_v15 = vld [vmem:[#allocation5 + $0x6e0] sm:$0xff]  ;;  %v279_v18 = vld [vmem:[#allocation5 + $0x6f0] sm:$0xff]  ;;  %v282_v19 = vld [vmem:[#allocation5 + $0x708] sm:$0xff] }
  0x70   :  { %995 = vmatpush1.bf16.msra.mxu1 %v994_v29  ;;  %869 = vmatprep.subr.bf16.mxu0 %v868_v30  ;;  %v888_v29 = vpack.c.bf16 %v246_v23, %v242_v22  ;;  %v241_v30 = vld [vmem:[#allocation5 + $0x5c0] sm:$0xff]  ;;  %v286_v20 = vld [vmem:[#allocation5 + $0x728] sm:$0xff]  ;;  %v288_v22 = vld [vmem:[#allocation5 + $0x738] sm:$0xff]  ;;  %v906_v23 = vpack.c.bf16 %v277_v15, %v273_v14 }
  0x71   :  { %997 = vmatprep.subr.bf16.mxu1 %v996_v34  ;;  %476 = vmatprep.mubr.f32.mxu0 %v52_v24  ;;  %v247_v34 = vld [vmem:[#allocation5 + $0x5f0] sm:$0xff]  ;;  %v890_v39 = vpack.c.bf16 %v245_v31, %v241_v30  ;;  %v908_v25 = vpack.c.bf16 %v286_v20, %v282_v19  ;;  %v281_v26 = vld [vmem:[#allocation5 + $0x700] sm:$0xff]  ;;  %v290_v31 = vld [vmem:[#allocation5 + $0x748] sm:$0xff] }
  0x72   :  { %630 = vmatprep.mubr.f32.mxu1 %v52_v24  ;;  %v287_v30 = vld [vmem:[#allocation5 + $0x730] sm:$0xff]  ;;  %v289_v38 = vld [vmem:[#allocation5 + $0x740] sm:$0xff] }
  0x73   :  { %871 = vmatpush1.bf16.msra.mxu0 %v870_v40  ;;  %v1018_v40 = vpack.c.bf16 %v247_v34, %v243_v32  ;;  %v294_v32 = vld [vmem:[#allocation5 + $0x768] sm:$0xff]  ;;  %v296_v34 = vld [vmem:[#allocation5 + $0x778] sm:$0xff]  ;;  %v297_v50 = vld [vmem:[#allocation5 + $0x780] sm:$0xff] }
  0x74   :  { %999 = vmatpush1.bf16.msra.mxu1 %v998_v41  ;;  %873 = vmatprep.subr.bf16.mxu0 %v872_v42  ;;  %v892_v41 = vpack.c.bf16 %v254_v36, %v250_v35  ;;  %v249_v42 = vld [vmem:[#allocation5 + $0x600] sm:$0xff]  ;;  %v912_v37 = vpack.c.bf16 %v294_v32, %v290_v31 }
  0x75   :  { %1001 = vmatprep.subr.bf16.mxu1 %v1000_v46  ;;  %v255_v46 = vld [vmem:[#allocation5 + $0x630] sm:$0xff]  ;;  %v894_v51 = vpack.c.bf16 %v253_v43, %v249_v42  ;;  %v298_v43 = vld [vmem:[#allocation5 + $0x788] sm:$0xff]  ;;  %v305_v62 = vld [vmem:[#allocation5 + $0x7c0] sm:$0xff] }
  0x76   :  { %v295_v42 = vld [vmem:[#allocation5 + $0x770] sm:$0xff] }
  0x77   :  { %875 = vmatpush1.bf16.msra.mxu0 %v874_v52  ;;  %v1022_v52 = vpack.c.bf16 %v255_v46, %v251_v44  ;;  %v302_v44 = vld [vmem:[#allocation5 + $0x7a8] sm:$0xff]  ;;  %v304_v46 = vld [vmem:[#allocation5 + $0x7b8] sm:$0xff] }
  0x78   :  { %1003 = vmatpush1.bf16.msra.mxu1 %v1002_v53  ;;  %877 = vmatprep.subr.bf16.mxu0 %v876_v54  ;;  %v896_v53 = vpack.c.bf16 %v262_v48, %v258_v47  ;;  %v257_v54 = vld [vmem:[#allocation5 + $0x640] sm:$0xff]  ;;  %v916_v49 = vpack.c.bf16 %v302_v44, %v298_v43 }
  0x79   :  { %1005 = vmatprep.subr.bf16.mxu1 %v1004_v58  ;;  %v263_v58 = vld [vmem:[#allocation5 + $0x670] sm:$0xff]  ;;  %v898_v63 = vpack.c.bf16 %v261_v55, %v257_v54  ;;  %v306_v55 = vld [vmem:[#allocation5 + $0x7c8] sm:$0xff] }
  0x7a   :  { %v303_v54 = vld [vmem:[#allocation5 + $0x7b0] sm:$0xff] }
  0x7b   :  { %879 = vmatpush1.bf16.msra.mxu0 %v878_v0  ;;  %v1026_v0 = vpack.c.bf16 %v263_v58, %v259_v56  ;;  %v310_v56 = vld [vmem:[#allocation5 + $0x7e8] sm:$0xff]  ;;  %v312_v58 = vld [vmem:[#allocation5 + $0x7f8] sm:$0xff] }
  0x7c   :  { %1007 = vmatpush1.bf16.msra.mxu1 %v1006_v1  ;;  %881 = vmatprep.subr.bf16.mxu0 %v880_v2  ;;  %v900_v1 = vpack.c.bf16 %v270_v60, %v266_v59  ;;  %v265_v2 = vld [vmem:[#allocation5 + $0x680] sm:$0xff]  ;;  %v920_v61 = vpack.c.bf16 %v310_v56, %v306_v55 }
  0x7d   :  { %1009 = vmatprep.subr.bf16.mxu1 %v1008_v6  ;;  %v271_v6 = vld [vmem:[#allocation5 + $0x6b0] sm:$0xff]  ;;  %v902_v11 = vpack.c.bf16 %v269_v3, %v265_v2 }
  0x7e   :  { %v1030_v12 = vpack.c.bf16 %v271_v6, %v267_v4  ;;  %v311_v2 = vld [vmem:[#allocation5 + $0x7f0] sm:$0xff]  ;;  %v56_v6 = vld [vmem:[#allocation2 + $0x38] sm:$0xff] }
  0x7f   :  { %883 = vmatpush1.bf16.msra.mxu0 %v882_v13  ;;  %v904_v13 = vpack.c.bf16 %v278_v8, %v274_v7  ;;  %v55_v7 = vld [vmem:[#allocation2 + $0x30] sm:$0xff]  ;;  %v315_v8 = vlaneseq }
  0x80   :  { %1011 = vmatpush1.bf16.msra.mxu1 %v1010_v16  ;;  %885 = vmatprep.subr.bf16.mxu0 %v884_v17  ;;  %v275_v16 = vld [vmem:[#allocation5 + $0x6d0] sm:$0xff]  ;;  %v1032_v17 = vpack.c.bf16 %v280_v10, %v276_v9 }
  0x81   :  { %1013 = vmatprep.subr.bf16.mxu1 %v1012_v21  ;;  %v284_v21 = vld [vmem:[#allocation5 + $0x718] sm:$0xff]  ;;  %v1034_v24 = vpack.c.bf16 %v279_v18, %v275_v16  ;;  %v316_v9 = vshrl.u32 %v315_v8, 7 }
  0x83   :  { %887 = vmatpush1.bf16.msra.mxu0 %v886_v27  ;;  %v285_v27 = vld [vmem:[#allocation5 + $0x720] sm:$0xff]  ;;  %v1214_v10 = vsub.s32 0, %v316_v9  ;;  %v1224_v15 = vsub.s32 3, %v316_v9 }
  0x84   :  { %1015 = vmatpush1.bf16.msra.mxu1 %v1014_v28  ;;  %889 = vmatprep.subr.bf16.mxu0 %v888_v29  ;;  %v283_v28 = vld [vmem:[#allocation5 + $0x710] sm:$0xff]  ;;  %v1036_v29 = vpack.c.bf16 %v288_v22, %v284_v21  ;;  %v910_v35 = vpack.c.bf16 %v285_v27, %v281_v26 }
  0x85   :  { %1017 = vmatprep.subr.bf16.mxu1 %v1016_v33  ;;  %v292_v33 = vld [vmem:[#allocation5 + $0x758] sm:$0xff]  ;;  %v1038_v36 = vpack.c.bf16 %v287_v30, %v283_v28 }
  0x87   :  { %891 = vmatpush1.bf16.msra.mxu0 %v890_v39  ;;  %v293_v39 = vld [vmem:[#allocation5 + $0x760] sm:$0xff] }
  0x88   :  { %1019 = vmatpush1.bf16.msra.mxu1 %v1018_v40  ;;  %893 = vmatprep.subr.bf16.mxu0 %v892_v41  ;;  %v291_v40 = vld [vmem:[#allocation5 + $0x750] sm:$0xff]  ;;  %v1040_v41 = vpack.c.bf16 %v296_v34, %v292_v33  ;;  %v914_v47 = vpack.c.bf16 %v293_v39, %v289_v38 }
  0x89   :  { %1021 = vmatprep.subr.bf16.mxu1 %v1020_v45  ;;  %v300_v45 = vld [vmem:[#allocation5 + $0x798] sm:$0xff]  ;;  %v1042_v48 = vpack.c.bf16 %v295_v42, %v291_v40 }
  0x8b   :  { %895 = vmatpush1.bf16.msra.mxu0 %v894_v51  ;;  %v301_v51 = vld [vmem:[#allocation5 + $0x7a0] sm:$0xff] }
  0x8c   :  { %1023 = vmatpush1.bf16.msra.mxu1 %v1022_v52  ;;  %897 = vmatprep.subr.bf16.mxu0 %v896_v53  ;;  %v299_v52 = vld [vmem:[#allocation5 + $0x790] sm:$0xff]  ;;  %v1044_v53 = vpack.c.bf16 %v304_v46, %v300_v45  ;;  %v918_v59 = vpack.c.bf16 %v301_v51, %v297_v50 }
  0x8d   :  { %1025 = vmatprep.subr.bf16.mxu1 %v1024_v57  ;;  %v308_v57 = vld [vmem:[#allocation5 + $0x7d8] sm:$0xff]  ;;  %v1046_v60 = vpack.c.bf16 %v303_v54, %v299_v52 }
  0x8f   :  { %899 = vmatpush1.bf16.msra.mxu0 %v898_v63  ;;  %v309_v63 = vld [vmem:[#allocation5 + $0x7e0] sm:$0xff] }
  0x90   :  { %1027 = vmatpush1.bf16.msra.mxu1 %v1026_v0  ;;  %901 = vmatprep.subr.bf16.mxu0 %v900_v1  ;;  %v1048_v0 = vpack.c.bf16 %v312_v58, %v308_v57  ;;  %v307_v1 = vld [vmem:[#allocation5 + $0x7d0] sm:$0xff]  ;;  %v922_v3 = vpack.c.bf16 %v309_v63, %v305_v62 }
  0x91   :  { %1029 = vmatprep.subr.bf16.mxu1 %v1028_v5  ;;  %v1050_v4 = vpack.c.bf16 %v311_v2, %v307_v1  ;;  %v51_v5 = vld [vmem:[#allocation2 + $0x10] sm:$0xff] }
  0x93   :  { %903 = vmatpush1.bf16.msra.mxu0 %v902_v11  ;;  %v313_v11 = vld [vmem:[%s1308_s2] sm:$0xf] }
  0x94   :  { %1031 = vmatpush1.bf16.msra.mxu1 %v1030_v12  ;;  %905 = vmatprep.subr.bf16.mxu0 %v904_v13  ;;  %v1219_v12 = vsub.s32 1, %v316_v9  ;;  %v1221_v13 = vsub.s32 2, %v316_v9  ;;  %v318_v14 = vrot.slane %v313_v11, %v1214_v10  ;;  %v330_v22 = vrot.slane %v313_v11, %v1224_v15 }
  0x95   :  { %1033 = vmatprep.subr.bf16.mxu1 %v1032_v17 }
  0x96   :  { %v322_v16 = vrot.slane %v313_v11, %v1219_v12  ;;  %v326_v17 = vrot.slane %v313_v11, %v1221_v13 }
  0x97   :  { %907 = vmatpush1.bf16.msra.mxu0 %v906_v23 }
  0x98   :  { %1035 = vmatpush1.bf16.msra.mxu1 %v1034_v24  ;;  %909 = vmatprep.subr.bf16.mxu0 %v908_v25 }
  0x99   :  { %1037 = vmatprep.subr.bf16.mxu1 %v1036_v29 }
  0x9b   :  { %911 = vmatpush1.bf16.msra.mxu0 %v910_v35 }
  0x9c   :  { %1039 = vmatpush1.bf16.msra.mxu1 %v1038_v36  ;;  %913 = vmatprep.subr.bf16.mxu0 %v912_v37 }
  0x9d   :  { %1041 = vmatprep.subr.bf16.mxu1 %v1040_v41 }
  0x9f   :  { %915 = vmatpush1.bf16.msra.mxu0 %v914_v47 }
  0xa0   :  { %1043 = vmatpush1.bf16.msra.mxu1 %v1042_v48  ;;  %917 = vmatprep.subr.bf16.mxu0 %v916_v49 }
  0xa1   :  { %1045 = vmatprep.subr.bf16.mxu1 %v1044_v53 }
  0xa3   :  { %919 = vmatpush1.bf16.msra.mxu0 %v918_v59 }
  0xa4   :  { %1047 = vmatpush1.bf16.msra.mxu1 %v1046_v60  ;;  %921 = vmatprep.subr.bf16.mxu0 %v920_v61 }
  0xa5   :  { %1049 = vmatprep.subr.bf16.mxu1 %v1048_v0 }
  0xa7   :  { %923 = vmatpush1.bf16.msra.mxu0 %v922_v3 }
  0xa8   :  { %1051 = vmatpush1.bf16.msra.mxu1 %v1050_v4 }
  0xaa   :  { %477 = vmatmul.mubr.f32.vlgmr.msra.gmra.mrb[0].mxu0 %v51_v5 }
  0xab   :  { %631 = vmatmul.mubr.f32.vlgmr.msra.gmra.mrb[0].mxu1 %v51_v5  ;;  %482 = vmatprep.mubr.f32.mxu0 %v56_v6 }
  0xac   :  { %636 = vmatprep.mubr.f32.mxu1 %v56_v6 }
  0xae   :  { %483 = vmatmul.mubr.f32.gmra.mrb[2].mxu0 %v55_v7 }
  0xaf   :  { %637 = vmatmul.mubr.f32.gmra.mrb[2].mxu1 %v55_v7  ;;  %v686_v7 = vld [vmem:[%s1309_s3] sm:$0xf]  ;;  %s1153_s3 = smov [#allocation7]  }
  0xb0   :  { %v691_v8 = vrot.slane %v686_v7, %v1214_v10  ;;  %v699_v9 = vrot.slane %v686_v7, %v1221_v13  ;;  %v695_v11 = vrot.slane %v686_v7, %v1219_v12 }
 0x17d   :  { %v478_v18 = vpop.f32.mrb[0].mxu0 }
 0x17e   :  { %v1228_v19 = vadd.f32 %v478_v18, %v318_v14  ;;  %v632_v20 = vpop.f32.mrb[0].mxu1  ;;  %v480_v21 = vpop.f32.mrb[1].mxu0 }
 0x17f   :  { %v1231_v23 = vadd.f32 %v480_v21, %v322_v16  ;;  %v634_v24 = vpop.f32.mrb[1].mxu1  ;;  %v1235_v26 = vadd.f32 %v632_v20, %v326_v17 }
 0x180   :  { %v656_v25 = vmul.f32 %v1228_v19, %v1228_v19  ;;  %v1241_v30 = vadd.f32 %v634_v24, %v330_v22 }
 0x181   :  { %v657_v27 = vmul.f32 %v1231_v23, %v1231_v23  ;;  %v484_v28 = vpop.f32.mrb[2].mxu0  ;;  %v643_v29 = vadd.f32 %v1231_v23, %v1228_v19  ;;  %v658_v40 = vmul.f32 %v1235_v26, %v1235_v26 }
 0x182   :  { %v1243_v31 = vadd.f32 %v484_v28, %v318_v14  ;;  %v638_v32 = vpop.f32.mrb[2].mxu1  ;;  %v486_v33 = vpop.f32.mrb[3].mxu0  ;;  %v659_v45 = vmul.f32 %v1241_v30, %v1241_v30  ;;  %v703_v14 = vrot.slane %v686_v7, %v1224_v15 }
 0x183   :  { %v1245_v34 = vadd.f32 %v638_v32, %v326_v17  ;;  %v1247_v35 = vadd.f32 %v486_v33, %v322_v16  ;;  %v640_v36 = vpop.f32.mrb[3].mxu1  ;;  %v644_v37 = vadd.f32 %v1235_v26, %v643_v29  ;;  %v664_v38 = vadd.f32 %v657_v27, %v656_v25  ;;  %v732_v16 = vld [vmem:[%s1310_s4] sm:$0xf]  ;;  %s783_s4 = sshll.u32 %s1153_s3, 4  ;;  %s784_s4 = int_to_ptr.vmem [resolvable:$true] %s783_s4 }
 0x184   :  { %v660_v39 = vmul.f32 %v1243_v31, %v1243_v31  ;;  %v1258_v43 = vadd.f32 %v640_v36, %v330_v22  ;;  %v737_v29 = vrot.slane %v732_v16, %v1214_v10  ;;  %v745_v32 = vrot.slane %v732_v16, %v1221_v13  ;;  %s1121_s22 = scalar_lea.vmem %s784_s4, 1024  ;;  %p1126_p3 = scmp.lt.s32.totalorder %s784_s4, %s784_s4 }
 0x185   :  { %v648_v41 = vadd.f32 %v1247_v35, %v1243_v31  ;;  %v661_v42 = vmul.f32 %v1247_v35, %v1247_v35  ;;  %v645_v44 = vadd.f32 %v1241_v30, %v644_v37  ;;  %v665_v46 = vadd.f32 %v664_v38, %v658_v40  ;;  %p1122_p2 = scmp.ne.s32.totalorder %s784_s4, %s1121_s22  ;;  %p1127_p4 = scmp.lt.s32.totalorder %s1121_s22, %s1121_s22 }
 0x186   :  { %v662_v47 = vmul.f32 %v1245_v34, %v1245_v34  ;;  %v663_v52 = vmul.f32 %v1258_v43, %v1258_v43  ;;  %v741_v33 = vrot.slane %v732_v16, %v1219_v12  ;;  %v749_v36 = vrot.slane %v732_v16, %v1224_v15 }
 0x187   :  { %646 = vadd.xlane.f32.xlu0 %v645_v44  ;;  %v649_v48 = vadd.f32 %v1245_v34, %v648_v41  ;;  %v669_v49 = vadd.f32 %v661_v42, %v660_v39  ;;  %v666_v50 = vadd.f32 %v665_v46, %v659_v45  ;;  %p1128_p5 = por %p1127_p4, %p1126_p3 }
 0x189   :  { %v650_v51 = vadd.f32 %v1258_v43, %v649_v48  ;;  %v670_v53 = vadd.f32 %v669_v49, %v662_v47  ;;  %667 = vadd.xlane.f32.xlu1 %v666_v50  ;;  %p1129_p6 = pnand %p1128_p5, %p1122_p2 }
 0x18b   :  { %651 = vadd.xlane.f32.xlu0 %v650_v51  ;;  %v671_v54 = vadd.f32 %v670_v53, %v663_v52 }
 0x18d   :  { %672 = vadd.xlane.f32.xlu1 %v671_v54 }
 0x214   :  { %v647_v55 = vpop.xlane.xlu0 %646 }
 0x215   :  { %v654_v56 = vmul.f32 0.001953125, %v647_v55 }
 0x216   :  { %v668_v57 = vpop.xlane.xlu1 %667 }
 0x217   :  { %v674_v58 = vmul.f32 0.001953125, %v668_v57  ;;  %v676_v59 = vmul.f32 %v654_v56, %v654_v56  ;;  %v716_v18 = vsub.f32 %v1228_v19, %v654_v56  ;;  %v717_v20 = vsub.f32 %v1231_v23, %v654_v56 }
 0x218   :  { %v652_v60 = vpop.xlane.xlu0 %651  ;;  %v718_v21 = vsub.f32 %v1235_v26, %v654_v56  ;;  %v719_v22 = vsub.f32 %v1241_v30, %v654_v56 }
 0x219   :  { %v655_v61 = vmul.f32 0.001953125, %v652_v60  ;;  %v678_v62 = vsub.f32 %v674_v58, %v676_v59 }
 0x21a   :  { %v673_v63 = vpop.xlane.xlu1 %672 }
 0x21b   :  { %v680_v0 = vmax.f32 %v678_v62, 0.0  ;;  %v675_v1 = vmul.f32 0.001953125, %v673_v63  ;;  %v677_v2 = vmul.f32 %v655_v61, %v655_v61  ;;  %v720_v26 = vsub.f32 %v1243_v31, %v655_v61 }
 0x21c   :  { %v721_v30 = vsub.f32 %v1247_v35, %v655_v61  ;;  %v722_v40 = vsub.f32 %v1245_v34, %v655_v61  ;;  %v723_v41 = vsub.f32 %v1258_v43, %v655_v61 }
 0x21d   :  { %v682_v3 = vadd.f32 1e-05, %v680_v0  ;;  %v679_v4 = vsub.f32 %v675_v1, %v677_v2 }
 0x21f   :  { %1073 = vrsqrt.f32 %v682_v3  ;;  %v681_v5 = vmax.f32 %v679_v4, 0.0 }
 0x221   :  { %v683_v6 = vadd.f32 1e-05, %v681_v5 }
 0x223   :  { %1075 = vrsqrt.f32 %v683_v6 }
 0x229   :  { %v1074_v17 = vpop.eup %1073 }
 0x22a   :  { %v708_v24 = vmul.f32 %v1074_v17, %v691_v8  ;;  %v709_v25 = vmul.f32 %v1074_v17, %v695_v11  ;;  %v710_v27 = vmul.f32 %v1074_v17, %v699_v9  ;;  %v711_v28 = vmul.f32 %v1074_v17, %v703_v14 }
 0x22c   :  { %v724_v37 = vmul.f32 %v716_v18, %v708_v24  ;;  %v725_v19 = vmul.f32 %v717_v20, %v709_v25  ;;  %v726_v38 = vmul.f32 %v718_v21, %v710_v27  ;;  %v727_v23 = vmul.f32 %v719_v22, %v711_v28 }
 0x22d   :  { %v1076_v39 = vpop.eup %1075 }
 0x22e   :  { %v712_v10 = vmul.f32 %v1076_v39, %v691_v8  ;;  %v713_v42 = vmul.f32 %v1076_v39, %v695_v11  ;;  %v714_v13 = vmul.f32 %v1076_v39, %v699_v9  ;;  %v715_v44 = vmul.f32 %v1076_v39, %v703_v14 }
 0x22f   :  { %v754_v12 = vadd.f32 %v737_v29, %v724_v37  ;;  %v755_v45 = vadd.f32 %v741_v33, %v725_v19  ;;  %v756_v15 = vadd.f32 %v745_v32, %v726_v38  ;;  %v757_v46 = vadd.f32 %v749_v36, %v727_v23 }
 0x230   :  { %v728_v47 = vmul.f32 %v720_v26, %v712_v10  ;;  %v729_v48 = vmul.f32 %v721_v30, %v713_v42  ;;  %v730_v49 = vmul.f32 %v722_v40, %v714_v13  ;;  %v731_v50 = vmul.f32 %v723_v41, %v715_v44 }
 0x231   :  { %v762_v51 = vmax.f32 %v754_v12, 0.0  ;;  %v763_v31 = vmax.f32 %v755_v45, 0.0  ;;  %v764_v52 = vmax.f32 %v756_v15, 0.0  ;;  %v765_v35 = vmax.f32 %v757_v46, 0.0 }
 0x232   :  { %v758_v34 = vadd.f32 %v737_v29, %v728_v47  ;;  %v759_v43 = vadd.f32 %v741_v33, %v729_v48  ;;  %v760_v53 = vadd.f32 %v745_v32, %v730_v49  ;;  %v761_v54 = vadd.f32 %v749_v36, %v731_v50 }
 0x233   :  { %770 = vst [vmem:[#allocation7] sm:$0xff] %v762_v51  ;;  %771 = vst [vmem:[#allocation7 + $0x8] sm:$0xff] %v763_v31 }
 0x234   :  { %772 = vst [vmem:[#allocation7 + $0x10] sm:$0xff] %v764_v52  ;;  %773 = vst [vmem:[#allocation7 + $0x18] sm:$0xff] %v765_v35  ;;  %v766_v55 = vmax.f32 %v758_v34, 0.0  ;;  %v767_v56 = vmax.f32 %v759_v43, 0.0  ;;  %v768_v57 = vmax.f32 %v760_v53, 0.0  ;;  %v769_v58 = vmax.f32 %v761_v54, 0.0 }
 0x236   :  { %774 = vst [vmem:[#allocation7 + $0x20] sm:$0xff] %v766_v55  ;;  %775 = vst [vmem:[#allocation7 + $0x28] sm:$0xff] %v767_v56 }
 0x237   :  { %776 = vst [vmem:[#allocation7 + $0x30] sm:$0xff] %v768_v57  ;;  %777 = vst [vmem:[#allocation7 + $0x38] sm:$0xff] %v769_v58 }
 0x238   :  { %1132 = shalt.err (!%p1129_p6)
}
 0x239   :  { %s1133_s25 = scalar_lea.hbm %s1311_s5, 1024 }
 0x23a   :  { %p1134_p7 = scmp.ne.s32.totalorder %s1311_s5, %s1133_s25  ;;  %p1137_p8 = scmp.lt.u32.totalorder %s1133_s25, %s1311_s5 }
 0x23c   :  { %p1139_p9 = pnand %p1137_p8, %p1134_p7 }
 0x23e   :  { %1142 = shalt.err (!%p1139_p9)
}
 0x23f   :  { %789 = dma.vmem_to_hbm [thread:$0]  %s784_s4, 1024, %s1311_s5, [#allocation4], %s1150_s28, %s1150_s28, %s1151_s29  }
 0x240   :  { %1147 = dma.done.wait [#allocation4], 1024  }
 0x241   :  { %1148 = vsyncadd [#allocation4], 4294966272 }
 0x242   :  { %793 = vsyncpa [#allocation3], 1 }
 0x243   :  { %794 = vsyncpa [#allocation6], 1 }
 0x244   :  { %795 = vsyncpa [#allocation4], 1 }

</bundles_post_ra>
